<compile_context>
chip_gen: v7x
topology: tpu7x:2x2x1
jax: 0.10.0
libtpu: 0.0.40
codegen_flags: <defaults>
</compile_context>

<pallas_src>
import functools

import jax
import jax.numpy as jnp
import numpy as np
from jax.experimental import pallas as pl
from jax.experimental.pallas import tpu as pltpu


_MAX_BLOCK_BYTES = 8 * 1024 * 1024   # per-buffer ceiling for the emb/out blocks


def _round_up(x, m):
    return ((x + m - 1) // m) * m


def _sublane(itemsize):
    # sublane packing of one vreg: 8 rows (f32), 16 (bf16/f16), 32 (int8)
    return 8 * max(1, 4 // itemsize)


def _vmem_budget():
    """Returns (physical_vmem_bytes, per-kernel block budget in bytes)."""
    phys = 64 << 20                               # conservative default = v7x physical
    try:
        cap = int(getattr(pltpu.get_tpu_info(), "vmem_capacity_bytes", 0) or 0)
        if cap > 0:
            phys = cap
    except Exception:
        pass
    # ~70% of physical, capped at 64 MiB: v5e/v6e (128 MiB) -> 64 MiB, v7x (64 MiB) -> ~44 MiB.
    return phys, min(64 << 20, int(phys * 0.7))


def _vmem_limit(need_bytes, phys):
    # Scoped limit = actual requirement + headroom for Mosaic internal scratch.
    return int(min(max(16 << 20, need_bytes + (8 << 20)), int(phys * 0.85)))


# --------------------------------------------------------------------------------------
# Cached positional-encoding tables (built once per shape, reused across calls).
# --------------------------------------------------------------------------------------
@functools.lru_cache(maxsize=16)
def _pe_table_f32(seq_len, dim):
    """(seq_len, dim) fp32 table, exactly as the torch module builds its `pe` buffer:
    per-full-index frequencies, sin on even columns, cos on odd columns."""
    pos = jnp.arange(seq_len, dtype=jnp.float32)[:, None]                 # (L, 1)
    two_i = jnp.arange(0, 2 * dim, 2, dtype=jnp.float32)[None, :]         # (1, D)
    angle = pos * (1.0 / (10000.0 ** (two_i / float(dim))))               # (L, D)
    pe = jnp.zeros((seq_len, dim), jnp.float32)
    pe = pe.at[:, 0::2].set(jnp.sin(angle[:, 0::2]))                      # sin on even cols
    pe = pe.at[:, 1::2].set(jnp.cos(angle[:, 1::2]))                      # cos on odd cols
    return jax.block_until_ready(jax.device_put(pe))


@functools.lru_cache(maxsize=16)
def _pe_expanded_cached(seq_len, batch, dim, dtype_name):
    """pe broadcast over batch and flattened to (seq_len*batch, dim) in the emb dtype.
    Used by the small-batch (flattened) path; built once per shape."""
    pe2d = _pe_table_f32(seq_len, dim)
    flat = jnp.broadcast_to(pe2d[:, None, :], (seq_len, batch, dim)
                            ).reshape(seq_len * batch, dim)
    return jax.block_until_ready(flat.astype(jnp.dtype(dtype_name)))


def make_pe_table(seq_len, dim, dtype=jnp.float32):
    """(seq_len, 1, dim) buffer identical to the torch module's `pe` (usable as pe=...)."""
    return _pe_table_f32(seq_len, dim).astype(dtype)[:, None, :]


# --------------------------------------------------------------------------------------
# Tile selection
# --------------------------------------------------------------------------------------
def _pick_tiles_3d(L, B, D, itemsize, budget):
    """(seq_tile, batch_tile) for the (L, B, D) blocked path."""
    sub = _sublane(itemsize)
    lanes = _round_up(D, 128)
    target = max(min(_MAX_BLOCK_BYTES, budget // 7), 1)   # 2x(emb+out) + 2x pe + headroom
    bt = B
    slab = _round_up(bt, sub) * lanes * itemsize          # padded bytes of one seq row
    while bt > sub and slab > target:
        bt = max(sub, _round_up(bt // 2, sub))
        slab = _round_up(bt, sub) * lanes * itemsize
    st = max(1, target // slab)
    if L * B * lanes * itemsize >= (4 << 20):             # enough work to care about steps
        nsteps = -(-L // st)
        if nsteps < 4:                                     # v7x: >=4 steps -> each core overlaps
            st = max(1, -(-L // 4))
        elif nsteps > 4 and (nsteps % 2):                  # even step count balances 2 cores
            st = max(1, -(-L // (nsteps + 1)))
    return min(st, L), bt


def _pick_rows_2d(nrows, D, itemsize, budget):
    """Row tile for the flattened (L*B, D) path."""
    sub = _sublane(itemsize)
    if nrows <= sub:
        return nrows
    lanes = _round_up(D, 128)
    target = max(min(_MAX_BLOCK_BYTES, budget // 8), sub * lanes * itemsize)
    rt = max(sub, (target // (lanes * itemsize)) // sub * sub)
    if nrows * lanes * itemsize >= (4 << 20):
        nsteps = -(-nrows // rt)
        if nsteps < 4:
            rt = _round_up(-(-nrows // 4), sub)
        elif nsteps > 4 and (nsteps % 2):
            rt = _round_up(-(-nrows // (nsteps + 1)), sub)
    return min(rt, nrows)


# --------------------------------------------------------------------------------------
# Kernel (shared by both paths): elementwise broadcast-add, fp32 accumulate, cast on store.
# --------------------------------------------------------------------------------------
def _add_pe_kernel(emb_ref, pe_ref, out_ref):
    out_ref[...] = (emb_ref[...] + pe_ref[...]).astype(out_ref.dtype)


# --------------------------------------------------------------------------------------
# Wrapper
# --------------------------------------------------------------------------------------
def positional_encoding(emb, dropout_p=0.0, *, pe=None, seq_tile=None,
                        batch_tile=None, max_len=5000):
    """emb: (seq_len, batch, dim). Returns emb + pe[:seq_len] (dropout = eval-mode identity)."""
    # TODO(synk): training-mode dropout (pltpu.prng_seed + stateful_bernoulli) not emitted;
    # nn.Dropout(dropout_p) is identity in eval mode, which is what this implements.
    L, B, D = emb.shape
    if L > max_len:
        raise ValueError(f"seq_len={L} exceeds max_len={max_len}")

    itemsize = jnp.dtype(emb.dtype).itemsize
    sub = _sublane(itemsize)
    phys, budget = _vmem_budget()
    lanes = _round_up(D, 128)

    # Optional user-supplied buffer (torch-style (max_len, 1, D) or (max_len, D)); fp32.
    pe2d = None
    if pe is not None:
        pe_arr = jnp.asarray(pe)
        if pe_arr.ndim == 3:
            pe_arr = pe_arr[:, 0, :]
        pe2d = pe_arr[:L, :D].astype(jnp.float32)

    # Small-batch path: an (st, B, D) block would pad its sublane dim >= 4x -> flatten.
    flatten = _round_up(B, sub) >= 4 * B

    if flatten:
        rows = L * B
        rt = seq_tile * B if seq_tile is not None else _pick_rows_2d(rows, D, itemsize, budget)
        rt = max(1, min(int(rt), rows))
        if rt < rows:
            rt = min(_round_up(rt, sub), rows)     # sublane-aligned unless full extent

        if pe2d is None:
            pe_flat = _pe_expanded_cached(L, B, D, jnp.dtype(emb.dtype).name)
        else:
            pe_flat = jnp.broadcast_to(pe2d[:, None, :], (L, B, D)
                                       ).reshape(rows, D).astype(emb.dtype)
        emb2 = emb.reshape(rows, D)                # free for contiguous (L, B, D) layout

        blk = _round_up(rt, sub) * lanes * itemsize
        need = 2 * 3 * blk                         # double-buffered emb + pe + out
        out = pl.pallas_call(
            _add_pe_kernel,
            out_shape=jax.ShapeDtypeStruct((rows, D), emb.dtype),
            grid=(pl.cdiv(rows, rt),),
            in_specs=[pl.BlockSpec((rt, D), lambda i: (i, 0)),
                      pl.BlockSpec((rt, D), lambda i: (i, 0))],
            out_specs=pl.BlockSpec((rt, D), lambda i: (i, 0)),
            compiler_params=pltpu.CompilerParams(
                dimension_semantics=("parallel",),
                vmem_limit_bytes=_vmem_limit(need, phys)),
            cost_estimate=pl.CostEstimate(
                flops=L * B * D, transcendentals=0,
                bytes_accessed=3 * L * B * D * itemsize),
        )(emb2, pe_flat)
        return out.reshape(L, B, D)

    # General path: 3-D blocks, pe kept as a tiny fp32 (L, 1, D) buffer (1/B of emb traffic).
    st_auto, bt_auto = _pick_tiles_3d(L, B, D, itemsize, budget)
    st = int(seq_tile) if seq_tile is not None else st_auto
    bt = int(batch_tile) if batch_tile is not None else bt_auto
    st = max(1, min(st, L))
    bt = max(1, min(bt, B))
    if bt < B:
        bt = min(_round_up(bt, sub), B)            # (bt, D) slab must be sublane-aligned

    if pe2d is None:
        pe2d = _pe_table_f32(L, D)
    pe3d = pe2d[:, None, :]                        # (L, 1, D) fp32

    emb_blk = st * _round_up(bt, sub) * lanes * itemsize
    pe_blk = st * 8 * lanes * 4                    # (st, 1, D) fp32: size-1 dim pads to 8 sublanes
    need = 2 * (2 * emb_blk + pe_blk)              # double-buffered emb + out + pe

    return pl.pallas_call(
        _add_pe_kernel,
        out_shape=jax.ShapeDtypeStruct((L, B, D), emb.dtype),
        grid=(pl.cdiv(L, st), pl.cdiv(B, bt)),
        in_specs=[
            pl.BlockSpec((st, bt, D), lambda i, j: (i, j, 0)),
            # pe's block index is constant along the inner batch axis j, so the pipeline
            # re-uses the buffer: pe is DMA'd once per seq tile (~1/B of emb traffic).
            pl.BlockSpec((st, 1, D), lambda i, j: (i, 0, 0)),
        ],
        out_specs=pl.BlockSpec((st, bt, D), lambda i, j: (i, j, 0)),
        compiler_params=pltpu.CompilerParams(
            dimension_semantics=("parallel", "parallel"),
            vmem_limit_bytes=_vmem_limit(need, phys)),
        cost_estimate=pl.CostEstimate(
            flops=L * B * D, transcendentals=0,
            bytes_accessed=2 * L * B * D * itemsize + L * D * 4),
    )(emb, pe3d)


# --------------------------------------------------------------------------------------
# Pure-numpy replica of the PyTorch module (buffer construction + forward, eval mode).
# --------------------------------------------------------------------------------------
def _reference_numpy(emb, max_len=5000):
    L, B, D = emb.shape
    pos = np.arange(0, max_len, dtype=np.float32)[:, None]                  # (max_len, 1)
    div_term = 1.0 / np.power(
        10000.0, np.arange(0, D * 2, 2, dtype=np.float32) / D)              # (D,)
    pe = pos * div_term[None, :]                                            # (max_len, D)
    pe[:, 0::2] = np.sin(pe[:, 0::2])
    pe[:, 1::2] = np.cos(pe[:, 1::2])
    pe = pe[:, None, :]                                                     # (max_len, 1, D)
    return emb + pe[:L, :1, :D]


if __name__ == "__main__":
    # Case 1: module-spec shapes (seq=8, batch=2, dim=32), f32 — small-batch flattened path.
    emb1 = jax.random.normal(jax.random.PRNGKey(0), (8, 2, 32), dtype=jnp.float32)
    out1 = jax.block_until_ready(positional_encoding(emb1, dropout_p=0.1))
    np.testing.assert_allclose(np.asarray(out1), _reference_numpy(np.asarray(emb1)),
                               rtol=1e-5, atol=1e-4)

    # Case 2: 3-D blocked path with a multi-step pipelined grid (explicit seq_tile).
    emb2 = jax.random.normal(jax.random.PRNGKey(1), (64, 8, 128), dtype=jnp.float32)
    out2 = jax.block_until_ready(positional_encoding(emb2, seq_tile=16))
    np.testing.assert_allclose(np.asarray(out2), _reference_numpy(np.asarray(emb2)),
                               rtol=1e-5, atol=1e-4)

    # Case 3: bf16 small batch -> flattened path, 4-step grid (loose bf16 tolerance).
    emb3 = jax.random.normal(jax.random.PRNGKey(2), (64, 2, 128), dtype=jnp.bfloat16)
    out3 = jax.block_until_ready(positional_encoding(emb3, seq_tile=16))
    ref3 = _reference_numpy(np.asarray(emb3, dtype=np.float32))
    np.testing.assert_allclose(np.asarray(out3, dtype=np.float32), ref3,
                               rtol=0.02, atol=0.05)

    # Case 4: bf16 with batch == sublane pack -> 3-D path, fp32 pe + fp32 accumulate.
    emb4 = jax.random.normal(jax.random.PRNGKey(3), (32, 16, 256), dtype=jnp.bfloat16)
    out4 = jax.block_until_ready(positional_encoding(emb4))
    ref4 = _reference_numpy(np.asarray(emb4, dtype=np.float32))
    np.testing.assert_allclose(np.asarray(out4, dtype=np.float32), ref4,
                               rtol=0.02, atol=0.05)

    print("KERNEL_OK")
</pallas_src>

<mosaic_0001>
module attributes {stable_mosaic.version = 11 : i64} {
  func.func @_add_pe_kernel(%arg0: i32, %arg1: memref<16x32xf32, #tpu.memory_space<vmem>>, %arg2: memref<16x32xf32, #tpu.memory_space<vmem>>, %arg3: memref<16x32xf32, #tpu.memory_space<vmem>>) attributes {dimension_semantics = [#tpu.dimension_semantics<parallel>], iteration_bounds = array<i64: 1>, scalar_prefetch = 0 : i64, scratch_operands = 0 : i64, tpu.core_type = #tpu.core_type<tc>, window_params = [{transform_indices = @transform_0, window_bounds = array<i64: 16, 32>}, {transform_indices = @transform_1, window_bounds = array<i64: 16, 32>}, {transform_indices = @transform_2, window_bounds = array<i64: 16, 32>}]} {
    %c0 = arith.constant 0 : index
    %c0_0 = arith.constant 0 : index
    %0 = vector.load %arg1[%c0, %c0_0] : memref<16x32xf32, #tpu.memory_space<vmem>>, vector<16x32xf32>
    %c0_1 = arith.constant 0 : index
    %c0_2 = arith.constant 0 : index
    %1 = vector.load %arg2[%c0_1, %c0_2] : memref<16x32xf32, #tpu.memory_space<vmem>>, vector<16x32xf32>
    %2 = arith.addf %0, %1 : vector<16x32xf32>
    %c0_3 = arith.constant 0 : index
    %c0_4 = arith.constant 0 : index
    %3 = vector.load %arg3[%c0_3, %c0_4] : memref<16x32xf32, #tpu.memory_space<vmem>>, vector<16x32xf32>
    tpu.vector_store %arg3[%c0_3, %c0_4], %2 {strides = array<i32>} : memref<16x32xf32, #tpu.memory_space<vmem>>, vector<16x32xf32>,
    return
  }
  func.func @transform_0(%arg0: i32) -> (i32, i32) {
    %c0_i32 = arith.constant 0 : i32
    %c0_i32_0 = arith.constant 0 : i32
    return %arg0, %c0_i32 : i32, i32
  }
  func.func @transform_1(%arg0: i32) -> (i32, i32) {
    %c0_i32 = arith.constant 0 : i32
    %c0_i32_0 = arith.constant 0 : i32
    return %arg0, %c0_i32 : i32, i32
  }
  func.func @transform_2(%arg0: i32) -> (i32, i32) {
    %c0_i32 = arith.constant 0 : i32
    %c0_i32_0 = arith.constant 0 : i32
    return %arg0, %c0_i32 : i32, i32
  }
}

</mosaic_0001>

<bundles_post_ra>
// kernel: tpu_custom_call.1
= control target key start
LH: loop header
LB: loop body
LE: loop exit
PB: predicated region body
PF: predicated region fallthrough
CT: control target
= control target key end

     0   :  { %7 = vsyncpa [#allocation3], 0  ;;  %s209_s0 = inlined_call_operand.hbm [shape: f32[16,32], index: 0, kind: input, shape index: {}]   ;;  %s210_s1 = inlined_call_operand.hbm [shape: f32[16,32], index: 1, kind: input, shape index: {}]   ;;  %s211_s2 = inlined_call_operand.hbm [shape: f32[16,32], index: 2, kind: output, shape index: {}]  }
   0x1   :  { %8 = vsyncpa [#allocation6], 0 }
   0x2   :  { %9 = vsyncpa [#allocation4], 0  ;;  %s144_s9 = smov [#allocation2]   ;;  %s72_s13 = scalar_lea.hbm %s209_s0, 256 }
   0x3   :  { %s15_s10 = sshll.u32 %s144_s9, 4  ;;  %p73_p0 = scmp.ne.s32.totalorder %s209_s0, %s72_s13  ;;  %s16_s10 = int_to_ptr.vmem [resolvable:$true] %s15_s10 }
   0x4   :  { %p76_p1 = scmp.lt.u32.totalorder %s72_s13, %s209_s0 }
   0x6   :  { %p78_p2 = pnand %p76_p1, %p73_p0 }
   0x8   :  { %81 = shalt.err (!%p78_p2)
}
   0x9   :  { %s82_s18 = scalar_lea.vmem %s16_s10, 256  ;;  %p87_p4 = scmp.lt.s32.totalorder %s16_s10, %s16_s10 }
   0xa   :  { %p83_p3 = scmp.ne.s32.totalorder %s16_s10, %s82_s18  ;;  %p88_p5 = scmp.lt.s32.totalorder %s82_s18, %s82_s18 }
   0xc   :  { %p89_p6 = por %p88_p5, %p87_p4 }
   0xe   :  { %p90_p7 = pnand %p89_p6, %p83_p3 }
  0x10   :  { %93 = shalt.err (!%p90_p7)
}
  0x11   :  { %s145_s19 = smov 128   ;;  %s146_s20 = smov 8  }
  0x12   :  { %21 = dma.hbm_to_vmem [thread:$0]  %s209_s0, 256, %s16_s10, [#allocation3], %s145_s19, %s145_s19, %s146_s20  }
  0x13   :  { %s147_s23 = smov [#allocation5]   ;;  %s94_s27 = scalar_lea.hbm %s210_s1, 256 }
  0x14   :  { %s27_s24 = sshll.u32 %s147_s23, 4  ;;  %p95_p8 = scmp.ne.s32.totalorder %s210_s1, %s94_s27  ;;  %s28_s24 = int_to_ptr.vmem [resolvable:$true] %s27_s24 }
  0x15   :  { %p98_p9 = scmp.lt.u32.totalorder %s94_s27, %s210_s1 }
  0x17   :  { %p100_p10 = pnand %p98_p9, %p95_p8 }
  0x19   :  { %103 = shalt.err (!%p100_p10)
}
  0x1a   :  { %s104_s4 = scalar_lea.vmem %s28_s24, 256  ;;  %p109_p12 = scmp.lt.s32.totalorder %s28_s24, %s28_s24 }
  0x1b   :  { %p105_p11 = scmp.ne.s32.totalorder %s28_s24, %s104_s4  ;;  %p110_p13 = scmp.lt.s32.totalorder %s104_s4, %s104_s4 }
  0x1d   :  { %p111_p0 = por %p110_p13, %p109_p12 }
  0x1f   :  { %p112_p1 = pnand %p111_p0, %p105_p11 }
  0x21   :  { %115 = shalt.err (!%p112_p1)
}
  0x22   :  { %33 = dma.hbm_to_vmem [thread:$0]  %s210_s1, 256, %s28_s24, [#allocation6], %s145_s19, %s145_s19, %s146_s20  }
  0x23   :  { %138 = dma.done.wait [#allocation3], 256  }
  0x24   :  { %139 = vsyncadd [#allocation3], 4294967040 }
  0x25   :  { %140 = dma.done.wait [#allocation6], 256  }
  0x26   :  { %141 = vsyncadd [#allocation6], 4294967040  ;;  %s148_s6 = smov [#allocation7]   ;;  %v40_v0 = vld [vmem:[#allocation2] sm:$0xff]  ;;  %v42_v1 = vld [vmem:[#allocation5] sm:$0xff]  ;;  %vm46_vm0 = vcmask 261120  }
  0x27   :  { %s54_s7 = sshll.u32 %s148_s6, 4  ;;  %v41_v2 = vld [vmem:[#allocation2 + $0x8] sm:$0xff]  ;;  %v44_v3 = vadd.f32 %v42_v1, %v40_v0  ;;  %v43_v4 = vld [vmem:[#allocation5 + $0x8] sm:$0xff]  ;;  %s55_s7 = int_to_ptr.vmem [resolvable:$true] %s54_s7 }
  0x28   :  { %v45_v5 = vadd.f32 %v43_v4, %v41_v2  ;;  %s116_s8 = scalar_lea.vmem %s55_s7, 256  ;;  %p121_p3 = scmp.lt.s32.totalorder %s55_s7, %s55_s7 }
  0x29   :  { %47 = vst.msk [vmem:[#allocation7] sm:$0xff] %vm46_vm0, %v44_v3  ;;  %p117_p2 = scmp.ne.s32.totalorder %s55_s7, %s116_s8  ;;  %p122_p4 = scmp.lt.s32.totalorder %s116_s8, %s116_s8 }
  0x2a   :  { %48 = vst.msk [vmem:[#allocation7 + $0x8] sm:$0xff] %vm46_vm0, %v45_v5 }
  0x2b   :  { %p123_p5 = por %p122_p4, %p121_p3 }
  0x2d   :  { %p124_p6 = pnand %p123_p5, %p117_p2 }
  0x2f   :  { %127 = shalt.err (!%p124_p6)
}
  0x30   :  { %s128_s10 = scalar_lea.hbm %s211_s2, 256 }
  0x31   :  { %p129_p7 = scmp.ne.s32.totalorder %s211_s2, %s128_s10  ;;  %p132_p8 = scmp.lt.u32.totalorder %s128_s10, %s211_s2 }
  0x33   :  { %p134_p9 = pnand %p132_p8, %p129_p7 }
  0x35   :  { %137 = shalt.err (!%p134_p9)
}
  0x36   :  { %60 = dma.vmem_to_hbm [thread:$0]  %s55_s7, 256, %s211_s2, [#allocation4], %s145_s19, %s145_s19, %s146_s20  }
  0x37   :  { %142 = dma.done.wait [#allocation4], 256  }
  0x38   :  { %143 = vsyncadd [#allocation4], 4294967040 }
  0x39   :  { %64 = vsyncpa [#allocation3], 1 }
  0x3a   :  { %65 = vsyncpa [#allocation6], 1 }
  0x3b   :  { %66 = vsyncpa [#allocation4], 1 }

</bundles_post_ra>
